<compile_context>
chip_gen: v6e
topology: v6e:2x2x1
jax: 0.10.0
libtpu: 0.0.40
codegen_flags: <defaults>
</compile_context>

<pallas_src>
import math
import functools

import jax
import jax.numpy as jnp
from jax.experimental import pallas as pl
from jax.experimental.pallas import tpu as pltpu

_LANE = 128
_SUB = 8


def _build_pos_enc(seq_len: int, emb_size: int) -> jnp.ndarray:
    """Deterministic sinusoidal table, identical math to the PyTorch __init__."""
    assert emb_size % 2 == 0, "emb_size must be even (same assumption as the PyTorch module)"
    pos = jnp.arange(seq_len, dtype=jnp.float32)[:, None]                 # (T, 1)
    div_term = jnp.exp(
        jnp.arange(0, emb_size, 2, dtype=jnp.float32)
        * (-math.log(10000.0) / emb_size)
    )                                                                      # (E/2,)
    pe = jnp.zeros((seq_len, emb_size), dtype=jnp.float32)
    pe = pe.at[:, 0::2].set(jnp.sin(pos * div_term))
    pe = pe.at[:, 1::2].set(jnp.cos(pos * div_term))
    return pe[None, :, :]                                                  # (1, T, E)


# ---------------------------------------------------------------------------
# Kernels (elementwise, DMA/VPU bound; no MXU work)
# ---------------------------------------------------------------------------

def _pe_add_kernel(x_ref, pe_ref, o_ref):
    # x_ref: (tb, tn), pe_ref: (1, tn) broadcast over the batch rows of the tile.
    o_ref[...] = (x_ref[...] + pe_ref[...]).astype(o_ref.dtype)


def _pe_add_dropout_kernel(x_ref, pe_ref, r_ref, o_ref, *, thresh, inv_keep):
    val = x_ref[...] + pe_ref[...]
    keep = r_ref[...] >= thresh            # integer-domain Bernoulli(1-p) keep mask
    o_ref[...] = jnp.where(keep, val * inv_keep, 0.0).astype(o_ref.dtype)


# ---------------------------------------------------------------------------
# Tiling + wrapper
# ---------------------------------------------------------------------------

def _choose_tiles(B: int, N: int, itemsize: int):
    # Lane-axis tile: lane-dense multiple of 128 (or the full axis when it cannot be),
    # capped at ~512 KiB of input per block-row.
    lane_cap = max(_LANE, ((512 * 1024 // itemsize) // _LANE) * _LANE)
    tn = min(N, lane_cap) if N % _LANE == 0 else N
    # Batch-axis tile: multiple of 8 sublanes (or full B); fuse batches so each grid
    # step moves roughly 0.5-4 MiB even when T*E is small.
    if B <= _SUB:
        tb = B
    else:
        want_rows = max(1, (2 * 1024 * 1024 // itemsize) // tn)
        tb = min(B, max(_SUB, (want_rows // _SUB) * _SUB))
        tb -= tb % _SUB
    return tb, tn


def positional_encoding_forward(x, pos_enc, *, dropout_rate=0.0,
                                training=False, rng_key=None):
    """x: (B, T, E); pos_enc: (1, seq_len, E).  Returns dropout(x + pos_enc[:, :T])."""
    B, T, E = x.shape
    assert pos_enc.ndim == 3 and pos_enc.shape[0] == 1 and pos_enc.shape[2] == E
    assert T <= pos_enc.shape[1], "sequence longer than the positional-encoding table"

    N = T * E
    x2 = x.reshape(B, N)                                     # lane-dense flatten (free)
    pe2 = pos_enc[:, :T, :].reshape(1, N).astype(x.dtype)

    itemsize = jnp.dtype(x.dtype).itemsize
    tb, tn = _choose_tiles(B, N, itemsize)
    grid = (pl.cdiv(N, tn), pl.cdiv(B, tb))                  # N-tiles outer, B-tiles inner

    x_spec = pl.BlockSpec((tb, tn), lambda j, i: (i, j))
    pe_spec = pl.BlockSpec((1, tn), lambda j, i: (0, j))     # constant over inner axis
    out_spec = pl.BlockSpec((tb, tn), lambda j, i: (i, j))

    use_dropout = bool(training) and float(dropout_rate) > 0.0
    bytes_accessed = (2 * B * N + N) * itemsize

    if use_dropout:
        if rng_key is None:
            rng_key = jax.random.PRNGKey(0)
        # 24-bit uniform integers; keep iff r >= p * 2^24  (keep prob = 1 - p).
        r24 = jax.random.randint(rng_key, (B, N), 0, 1 << 24, dtype=jnp.int32)
        thresh = int(round(float(dropout_rate) * (1 << 24)))
        inv_keep = 1.0 / (1.0 - float(dropout_rate))
        kernel = functools.partial(_pe_add_dropout_kernel,
                                   thresh=thresh, inv_keep=inv_keep)
        in_specs = [x_spec, pe_spec, pl.BlockSpec((tb, tn), lambda j, i: (i, j))]
        operands = (x2, pe2, r24)
        bytes_accessed += B * N * 4
    else:
        kernel = _pe_add_kernel
        in_specs = [x_spec, pe_spec]
        operands = (x2, pe2)

    out2 = pl.pallas_call(
        kernel,
        out_shape=jax.ShapeDtypeStruct((B, N), x.dtype),
        grid=grid,
        in_specs=in_specs,
        out_specs=out_spec,
        compiler_params=pltpu.CompilerParams(
            dimension_semantics=("parallel", "parallel"),
            vmem_limit_bytes=32 * 1024 * 1024),
        cost_estimate=pl.CostEstimate(
            flops=B * N, transcendentals=0, bytes_accessed=bytes_accessed),
    )(*operands)

    return out2.reshape(B, T, E)


if __name__ == "__main__":
    # Small shapes implied by the module: batch=2, seq=8, emb=32; table longer than T.
    B, T, E = 2, 8, 32
    seq_len = 16
    dropout = 0.1

    key = jax.random.PRNGKey(0)
    kx, kd = jax.random.split(key)
    x = jax.random.normal(kx, (B, T, E), dtype=jnp.float32)
    pos_enc = _build_pos_enc(seq_len, E)

    # Eval mode (dropout is identity), matching module.eval().
    out = positional_encoding_forward(x, pos_enc, dropout_rate=dropout, training=False)
    out = jax.block_until_ready(out)
    ref = x + pos_enc[:, :T, :]
    assert out.shape == (B, T, E)
    assert jnp.allclose(out, ref, atol=1e-6), "eval-mode mismatch vs reference"

    # Training mode: every output element must be either 0 (dropped) or (x+pe)/(1-p).
    out_tr = jax.block_until_ready(
        positional_encoding_forward(x, pos_enc, dropout_rate=dropout,
                                    training=True, rng_key=kd))
    assert out_tr.shape == (B, T, E)
    scaled = ref / (1.0 - dropout)
    elem_ok = (jnp.abs(out_tr) <= 1e-6) | (jnp.abs(out_tr - scaled) <= 1e-4)
    assert bool(jnp.all(elem_ok)), "training-mode dropout values inconsistent"

    print("KERNEL_OK")
</pallas_src>

<mosaic_0001>
module attributes {stable_mosaic.version = 11 : i64} {
  func.func @_pe_add_kernel(%arg0: i32, %arg1: i32, %arg2: memref<2x256xf32, #tpu.memory_space<vmem>>, %arg3: memref<1x256xf32, #tpu.memory_space<vmem>>, %arg4: memref<2x256xf32, #tpu.memory_space<vmem>>) attributes {dimension_semantics = [#tpu.dimension_semantics<parallel>, #tpu.dimension_semantics<parallel>], iteration_bounds = array<i64: 1, 1>, scalar_prefetch = 0 : i64, scratch_operands = 0 : i64, tpu.core_type = #tpu.core_type<tc>, window_params = [{transform_indices = @transform_0, window_bounds = array<i64: 2, 256>}, {transform_indices = @transform_1, window_bounds = array<i64: 1, 256>}, {transform_indices = @transform_2, window_bounds = array<i64: 2, 256>}]} {
    %c0 = arith.constant 0 : index
    %c0_0 = arith.constant 0 : index
    %0 = vector.load %arg2[%c0, %c0_0] : memref<2x256xf32, #tpu.memory_space<vmem>>, vector<2x256xf32>
    %c0_1 = arith.constant 0 : index
    %c0_2 = arith.constant 0 : index
    %1 = vector.load %arg3[%c0_1, %c0_2] : memref<1x256xf32, #tpu.memory_space<vmem>>, vector<1x256xf32>
    %2 = vector.broadcast %1 : vector<1x256xf32> to vector<2x256xf32>
    %3 = arith.addf %0, %2 : vector<2x256xf32>
    %c0_3 = arith.constant 0 : index
    %c0_4 = arith.constant 0 : index
    %4 = vector.load %arg4[%c0_3, %c0_4] : memref<2x256xf32, #tpu.memory_space<vmem>>, vector<2x256xf32>
    tpu.vector_store %arg4[%c0_3, %c0_4], %3 {strides = array<i32>} : memref<2x256xf32, #tpu.memory_space<vmem>>, vector<2x256xf32>,
    return
  }
  func.func @transform_0(%arg0: i32, %arg1: i32) -> (i32, i32) {
    %c0_i32 = arith.constant 0 : i32
    return %arg1, %arg0 : i32, i32
  }
  func.func @transform_1(%arg0: i32, %arg1: i32) -> (i32, i32) {
    %c0_i32 = arith.constant 0 : i32
    %c0_i32_0 = arith.constant 0 : i32
    return %c0_i32, %arg0 : i32, i32
  }
  func.func @transform_2(%arg0: i32, %arg1: i32) -> (i32, i32) {
    %c0_i32 = arith.constant 0 : i32
    return %arg1, %arg0 : i32, i32
  }
}

</mosaic_0001>

<bundles_post_ra>
// kernel: tpu_custom_call.1
= control target key start
LH: loop header
LB: loop body
LE: loop exit
PB: predicated region body
PF: predicated region fallthrough
CT: control target
= control target key end

     0   :  { %7 = vsyncpa [#allocation3], 0  ;;  %s172_s0 = inlined_call_operand.hbm [shape: f32[2,256], index: 0, kind: input, shape index: {}]   ;;  %s173_s1 = inlined_call_operand.hbm [shape: f32[1,256], index: 1, kind: input, shape index: {}]   ;;  %s174_s2 = inlined_call_operand.hbm [shape: f32[2,256], index: 2, kind: output, shape index: {}]  }
   0x1   :  { %8 = vsyncpa [#allocation6], 0 }
   0x2   :  { %9 = vsyncpa [#allocation4], 0  ;;  %s144_s9 = smov [#allocation2]   ;;  %s145_s11 = smov [#allocation5]  }
   0x3   :  { %s16_s10 = sshll.u32 %s144_s9, 4  ;;  %s26_s12 = sshll.u32 %s145_s11, 4  ;;  %s17_s10 = int_to_ptr.vmem [resolvable:$true] %s16_s10  ;;  %s27_s12 = int_to_ptr.vmem [resolvable:$true] %s26_s12 }
   0x4   :  { %s86_s13 = scalar_lea.vmem %s17_s10, 64  ;;  %p91_p1 = scmp.lt.s32.totalorder %s17_s10, %s17_s10 }
   0x5   :  { %p87_p0 = scmp.ne.s32.totalorder %s17_s10, %s86_s13  ;;  %p92_p2 = scmp.lt.s32.totalorder %s86_s13, %s86_s13 }
   0x7   :  { %p93_p3 = por %p92_p2, %p91_p1 }
   0x9   :  { %p94_p4 = pnand %p93_p3, %p87_p0 }
   0xb   :  { %97 = shalt.err (!%p94_p4)
}
   0xc   :  { %19 = dma.hbm_to_vmem [thread:$0]  %s172_s0, 64, %s17_s10, [#allocation3]  }
   0xd   :  { %s106_s16 = scalar_lea.vmem %s27_s12, 32  ;;  %p111_p6 = scmp.lt.s32.totalorder %s27_s12, %s27_s12 }
   0xe   :  { %p107_p5 = scmp.ne.s32.totalorder %s27_s12, %s106_s16  ;;  %p112_p7 = scmp.lt.s32.totalorder %s106_s16, %s106_s16 }
  0x10   :  { %p113_p8 = por %p112_p7, %p111_p6 }
  0x12   :  { %p114_p9 = pnand %p113_p8, %p107_p5 }
  0x14   :  { %117 = shalt.err (!%p114_p9)
}
  0x15   :  { %29 = dma.hbm_to_vmem [thread:$0]  %s173_s1, 32, %s27_s12, [#allocation6]  }
  0x16   :  { %138 = dma.done.wait [#allocation3], 64  }
  0x17   :  { %139 = vsyncadd [#allocation3], 4294967232 }
  0x18   :  { %140 = dma.done.wait [#allocation6], 32  }
  0x19   :  { %141 = vsyncadd [#allocation6], 4294967264  ;;  %v39_v0 = vlaneseq  ;;  %v146_v1 = vmov 1983009808   ;;  %v37_v7 = vld [vmem:[#allocation5] sm:$0x3] }
  0x1a   :  { %v49_v2 = vunpack.c.l.s4 %v146_v1  ;;  %v36_v12 = vld [vmem:[#allocation2] sm:$0xf]  ;;  %s147_s0 = smov [#allocation7]  }
  0x1b   :  { %v40_v3 = vshrl.u32 %v39_v0, 7  ;;  %s64_s19 = sshll.u32 %s147_s0, 4  ;;  %s65_s19 = int_to_ptr.vmem [resolvable:$true] %s64_s19 }
  0x1c   :  { %v50_v6 = vunpack.c.0.s8 %v49_v2  ;;  %s118_s1 = scalar_lea.vmem %s65_s19, 64  ;;  %p123_p11 = scmp.lt.s32.totalorder %s65_s19, %s65_s19 }
  0x1d   :  { %v41_v4 = vsub.s32 0, %v40_v3  ;;  %v45_v5 = vsub.s32 1, %v40_v3  ;;  %p119_p10 = scmp.ne.s32.totalorder %s65_s19, %s118_s1  ;;  %p124_p12 = scmp.lt.s32.totalorder %s118_s1, %s118_s1 }
  0x1e   :  { %v53_v10 = vsub.s32 %v50_v6, %v40_v3 }
  0x1f   :  { %v42_v8 = vrot.slane %v37_v7, %v41_v4  ;;  %v46_v9 = vrot.slane %v37_v7, %v45_v5  ;;  %p125_p13 = por %p124_p12, %p123_p11 }
  0x21   :  { %v47_v11 = vcombine.low %v42_v8, %v46_v9  ;;  %p126_p0 = pnand %p125_p13, %p119_p10 }
  0x23   :  { %v54_v13 = vrot.slane %v47_v11, %v53_v10 }
  0x25   :  { %v56_v14 = vadd.f32 %v54_v13, %v36_v12 }
  0x27   :  { %57 = vst [vmem:[#allocation7] sm:$0xf] %v56_v14 }
  0x28   :  { %129 = shalt.err (!%p126_p0)
}
  0x29   :  { %67 = dma.vmem_to_hbm [thread:$0]  %s65_s19, 64, %s174_s2, [#allocation4]  }
  0x2a   :  { %142 = dma.done.wait [#allocation4], 64  }
  0x2b   :  { %143 = vsyncadd [#allocation4], 4294967232 }
  0x2c   :  { %71 = vsyncpa [#allocation3], 1 }
  0x2d   :  { %72 = vsyncpa [#allocation6], 1 }
  0x2e   :  { %73 = vsyncpa [#allocation4], 1 }

</bundles_post_ra>
